<compile_context>
chip_gen: v7x
topology: tpu7x:2x2x1
jax: 0.10.0
libtpu: 0.0.40
codegen_flags: <defaults>
</compile_context>

<pallas_src>
import numpy as np
import jax
import jax.numpy as jnp
from jax.experimental import pallas as pl
from jax.experimental.pallas import tpu as pltpu


def _round_up(x, m):
    return ((x + m - 1) // m) * m


# --------------------------------------------------------------------------- #
# Kernels
# --------------------------------------------------------------------------- #

def _make_single_pass_kernel(c_r, n_real, n_pad):
    """Whole (C_P, N) slab per batch element, one grid step per element."""

    def kernel(x_ref, wf_ref, bf_ref, wsc_ref, bs_ref, bc1_ref, wc2_ref,
               bc2_ref, o_ref):
        x = x_ref[...]                                                # (C_P, N)

        # fusion_mlp: 1x1 conv (BN folded) + ReLU.  Weight on left, N on lanes,
        # bf16 operands with f32 MXU accumulation when compute_dtype=bf16.
        fused = jnp.dot(wf_ref[...], x, preferred_element_type=jnp.float32)
        fused = jnp.maximum(fused + bf_ref[...], 0.0)                 # (C_P, N) f32

        # one fused matmul feeding the spatial-att conv AND channel-att conv#1
        sc = jnp.dot(wsc_ref[...], fused.astype(wsc_ref.dtype),
                     preferred_element_type=jnp.float32)              # (2*C_r, N)

        # spatial attention: sublane (axis-0) XLU reduce -> sigmoid gate
        s_att = jax.nn.sigmoid(
            jnp.max(sc[:c_r, :] + bs_ref[...], axis=0, keepdims=True))  # (1, N)

        # channel attention.  The per-point spatial gate commutes with the 1x1
        # conv, so reuse the fused matmul:
        #   wc1 @ (s_att * fused) + bc1 == s_att * (wc1 @ fused) + bc1
        c1 = jnp.maximum(s_att * sc[c_r:, :] + bc1_ref[...], 0.0)     # (C_r, N)
        c2 = jnp.dot(wc2_ref[...], c1.astype(wc2_ref.dtype),
                     preferred_element_type=jnp.float32) + bc2_ref[...]
        if n_pad != n_real:  # mask padded tail columns out of the N-max
            col = jax.lax.broadcasted_iota(jnp.int32, c2.shape, 1)
            c2 = jnp.where(col < n_real, c2, -jnp.inf)
        c_att = jax.nn.sigmoid(jnp.max(c2, axis=1, keepdims=True))    # (C_P, 1)

        # no named 'gated' intermediate: single fused output store
        o_ref[...] = (c_att * (s_att * fused)).astype(o_ref.dtype)

    return kernel


def _make_pass1_kernel(c_r, n_real, n_tile, masked):
    """Two-pass schedule, pass 1: channel-att pre-activation max over N tiles."""

    def kernel(x_ref, wf_ref, bf_ref, wsc_ref, bs_ref, bc1_ref, wc2_ref,
               bc2_ref, cmax_ref):
        nt = pl.program_id(1)
        x = x_ref[...]                                                # (C_P, Nt)
        fused = jnp.maximum(
            jnp.dot(wf_ref[...], x, preferred_element_type=jnp.float32)
            + bf_ref[...], 0.0)
        sc = jnp.dot(wsc_ref[...], fused.astype(wsc_ref.dtype),
                     preferred_element_type=jnp.float32)
        s_att = jax.nn.sigmoid(
            jnp.max(sc[:c_r, :] + bs_ref[...], axis=0, keepdims=True))
        c1 = jnp.maximum(s_att * sc[c_r:, :] + bc1_ref[...], 0.0)
        c2 = jnp.dot(wc2_ref[...], c1.astype(wc2_ref.dtype),
                     preferred_element_type=jnp.float32) + bc2_ref[...]
        if masked:
            col = nt * n_tile + jax.lax.broadcasted_iota(jnp.int32, c2.shape, 1)
            c2 = jnp.where(col < n_real, c2, -jnp.inf)
        tile_max = jnp.max(c2, axis=1, keepdims=True)                 # (C_P, 1)

        @pl.when(nt == 0)
        def _():
            cmax_ref[...] = tile_max

        @pl.when(nt > 0)
        def _():
            cmax_ref[...] = jnp.maximum(cmax_ref[...], tile_max)

    return kernel


def _make_pass2_kernel():
    """Two-pass schedule, pass 2: recompute fusion/spatial gate, apply global
    channel gate.  N tiles are independent -> fully parallel grid."""

    def kernel(cmax_ref, x_ref, wf_ref, bf_ref, ws_ref, bs_ref, o_ref):
        x = x_ref[...]
        fused = jnp.maximum(
            jnp.dot(wf_ref[...], x, preferred_element_type=jnp.float32)
            + bf_ref[...], 0.0)
        s = jnp.dot(ws_ref[...], fused.astype(ws_ref.dtype),
                    preferred_element_type=jnp.float32) + bs_ref[...]
        s_att = jax.nn.sigmoid(jnp.max(s, axis=0, keepdims=True))     # (1, Nt)
        c_att = jax.nn.sigmoid(cmax_ref[...])                         # (C_P, 1)
        o_ref[...] = (c_att * (s_att * fused)).astype(o_ref.dtype)

    return kernel


# --------------------------------------------------------------------------- #
# Wrapper
# --------------------------------------------------------------------------- #

def pointwise_gate3(pts_img, img_feats, pts_feats, params, *, eps=1e-5,
                    compute_dtype=jnp.bfloat16, out_dtype=None,
                    n_tile=None, force_two_pass=False):
    """pts_feats: (B, C_P, N)  ->  (B, C_P, N) (native NCW, N on the lane axis)."""
    del pts_img, img_feats                       # unused by the PyTorch forward
    B, C_P, N = pts_feats.shape
    C_r = params["ws"].shape[0]
    out_dtype = pts_feats.dtype if out_dtype is None else out_dtype
    compute_dtype = jnp.dtype(compute_dtype)

    # --- parameter glue: fold BatchNorm1d (eval mode) into the fusion conv ---
    inv_std = 1.0 / jnp.sqrt(params["bn_var"] + eps)
    scale = params["bn_gamma"] * inv_std
    wf = (params["wf"] * scale[:, None]).astype(compute_dtype)        # (C_P, C_P)
    bf = (((params["bf"] - params["bn_mean"]) * scale
           + params["bn_beta"])[:, None]).astype(jnp.float32)         # (C_P, 1)
    # Fuse spatial-att + channel-att conv#1 into one (2*C_r, C_P) weight.
    # NOTE: the copy-free sc[:C_r]/sc[C_r:] split relies on C_r % 8 == 0 (f32
    # sublane tile); it stays correct otherwise, just not copy-free.
    wsc = jnp.concatenate([params["ws"], params["wc1"]], axis=0).astype(compute_dtype)
    ws = params["ws"].astype(compute_dtype)                           # pass-2 only
    bs = params["bs"][:, None].astype(jnp.float32)
    bc1 = params["bc1"][:, None].astype(jnp.float32)
    wc2 = params["wc2"].astype(compute_dtype)                         # (C_P, C_r)
    bc2 = params["bc2"][:, None].astype(jnp.float32)

    x = pts_feats.astype(compute_dtype)          # bf16 I/O halves HBM traffic
    in_elt = compute_dtype.itemsize
    out_elt = jnp.dtype(out_dtype).itemsize
    w_bytes = sum(int(a.size) * a.dtype.itemsize
                  for a in (wf, bf, wsc, ws, bs, bc1, wc2, bc2))

    # --- per-generation VMEM budget (v7x = 64 MiB/TC, v5e/v6e = 128 MiB) -----
    try:
        vmem_cap = int(pltpu.get_tpu_info().vmem_capacity_bytes)
    except Exception:
        vmem_cap = 64 << 20                      # conservative (v7x per-TC)
    budget = max(vmem_cap - (12 << 20), 16 << 20)

    def slab_bytes(nb):
        # double-buffered in + out blocks plus ~4 live f32 (C_P, nb) temporaries
        return (2 * in_elt + 2 * out_elt + 4 * 4) * C_P * nb

    def vmem_limit_for(nb):
        return int(min(budget, max(32 << 20, slab_bytes(nb) + 2 * w_bytes + (4 << 20))))

    n128 = _round_up(N, 128)                     # lane-dense (unmasked) stores
    single_pass = (not force_two_pass) and (
        slab_bytes(n128) + 2 * w_bytes + (2 << 20) <= budget)

    # ======================= single-pass (full-slab) path ====================
    if single_pass:
        n_pad = n128
        x_p = jnp.pad(x, ((0, 0), (0, 0), (0, n_pad - N))) if n_pad != N else x

        def w_spec(shape):
            return pl.BlockSpec(shape, lambda b: (0,) * len(shape))

        out = pl.pallas_call(
            _make_single_pass_kernel(C_r, N, n_pad),
            out_shape=jax.ShapeDtypeStruct((B, C_P, n_pad), out_dtype),
            grid=(B,),
            in_specs=[
                pl.BlockSpec((pl.Squeezed(), C_P, n_pad), lambda b: (b, 0, 0)),
                w_spec((C_P, C_P)), w_spec((C_P, 1)),
                w_spec((2 * C_r, C_P)), w_spec((C_r, 1)), w_spec((C_r, 1)),
                w_spec((C_P, C_r)), w_spec((C_P, 1)),
            ],
            out_specs=pl.BlockSpec((pl.Squeezed(), C_P, n_pad), lambda b: (b, 0, 0)),
            compiler_params=pltpu.CompilerParams(
                dimension_semantics=("parallel",),
                vmem_limit_bytes=vmem_limit_for(n_pad)),
            cost_estimate=pl.CostEstimate(
                flops=int(2 * B * n_pad * (C_P * C_P + 2 * C_r * C_P + C_P * C_r)),
                transcendentals=int(B * (n_pad + C_P)),
                bytes_accessed=int(B * C_P * n_pad * (in_elt + out_elt) + w_bytes)),
        )(x_p, wf, bf, wsc, bs, bc1, wc2, bc2)
        # TODO(synk): for small-N / large-B deployments, block several batch
        # elements per grid step (einsum 'oi,bin->bon') to amortize the ~0.35us
        # per-grid-step overhead.
        return out if n_pad == N else out[..., :N]

    # =============== two-pass N-tiled path (large N / forced) ================
    if n_tile is None:
        nt_cand = 16384
        while nt_cand > 1024 and slab_bytes(nt_cand) + 2 * w_bytes + (2 << 20) > budget:
            nt_cand //= 2
        n_tile = nt_cand
    n_tile = max(128, _round_up(int(n_tile), 128))
    num_tiles = max(1, -(-n128 // n_tile))
    n_tile = _round_up(-(-n128 // num_tiles), 128)   # rebalance to limit padding
    n_pad = n_tile * num_tiles
    x_p = jnp.pad(x, ((0, 0), (0, 0), (0, n_pad - N))) if n_pad != N else x
    masked = n_pad != N
    vmem_limit = vmem_limit_for(n_tile)

    def w_spec2(shape):
        return pl.BlockSpec(shape, lambda b, t: (0,) * len(shape))

    # pass 1: per-tile channel-attention pre-activation max, reduced over tiles
    cmax = pl.pallas_call(
        _make_pass1_kernel(C_r, N, n_tile, masked),
        out_shape=jax.ShapeDtypeStruct((B, C_P, 1), jnp.float32),
        grid=(B, num_tiles),
        in_specs=[
            pl.BlockSpec((pl.Squeezed(), C_P, n_tile), lambda b, t: (b, 0, t)),
            w_spec2((C_P, C_P)), w_spec2((C_P, 1)),
            w_spec2((2 * C_r, C_P)), w_spec2((C_r, 1)), w_spec2((C_r, 1)),
            w_spec2((C_P, C_r)), w_spec2((C_P, 1)),
        ],
        out_specs=pl.BlockSpec((pl.Squeezed(), C_P, 1), lambda b, t: (b, 0, 0)),
        compiler_params=pltpu.CompilerParams(
            dimension_semantics=("parallel", "arbitrary"),
            vmem_limit_bytes=vmem_limit),
        cost_estimate=pl.CostEstimate(
            flops=int(2 * B * n_pad * (C_P * C_P + 2 * C_r * C_P + C_P * C_r)),
            transcendentals=int(B * n_pad),
            bytes_accessed=int(B * C_P * (n_pad * in_elt + 4) + w_bytes)),
    )(x_p, wf, bf, wsc, bs, bc1, wc2, bc2)
    # TODO(synk): on v7x with B == 1, additionally split the pass-1 tile axis
    # across the two TensorCores (per-core partial maxes combined afterwards)
    # instead of relying on the batch axis alone for megacore sharding.

    # pass 2: recompute fusion/spatial gate per tile, apply global channel gate
    out = pl.pallas_call(
        _make_pass2_kernel(),
        out_shape=jax.ShapeDtypeStruct((B, C_P, n_pad), out_dtype),
        grid=(B, num_tiles),
        in_specs=[
            pl.BlockSpec((pl.Squeezed(), C_P, 1), lambda b, t: (b, 0, 0)),
            pl.BlockSpec((pl.Squeezed(), C_P, n_tile), lambda b, t: (b, 0, t)),
            w_spec2((C_P, C_P)), w_spec2((C_P, 1)),
            w_spec2((C_r, C_P)), w_spec2((C_r, 1)),
        ],
        out_specs=pl.BlockSpec((pl.Squeezed(), C_P, n_tile), lambda b, t: (b, 0, t)),
        compiler_params=pltpu.CompilerParams(
            dimension_semantics=("parallel", "parallel"),
            vmem_limit_bytes=vmem_limit),
        cost_estimate=pl.CostEstimate(
            flops=int(2 * B * n_pad * (C_P * C_P + C_r * C_P)),
            transcendentals=int(B * (n_pad + C_P)),
            bytes_accessed=int(B * C_P * n_pad * (in_elt + out_elt) + w_bytes)),
    )(cmax, x_p, wf, bf, ws, bs)
    return out if n_pad == N else out[..., :N]


# --------------------------------------------------------------------------- #
# Pure-JAX reference (PyTorch module, eval-mode BN)
# --------------------------------------------------------------------------- #

def ref_forward(pts_feats, params, eps=1e-5):
    x = pts_feats
    f = jnp.einsum("oi,bin->bon", params["wf"], x) + params["bf"][None, :, None]
    inv_std = 1.0 / jnp.sqrt(params["bn_var"] + eps)
    f = (f - params["bn_mean"][None, :, None]) * (params["bn_gamma"] * inv_std)[None, :, None] \
        + params["bn_beta"][None, :, None]
    f = jnp.maximum(f, 0.0)
    s = jnp.einsum("oi,bin->bon", params["ws"], f) + params["bs"][None, :, None]
    s_att = jax.nn.sigmoid(jnp.max(s, axis=1, keepdims=True))
    f = s_att * f
    c = jnp.einsum("oi,bin->bon", params["wc1"], f) + params["bc1"][None, :, None]
    c = jnp.maximum(c, 0.0)
    c = jnp.einsum("oi,bin->bon", params["wc2"], c) + params["bc2"][None, :, None]
    c_att = jax.nn.sigmoid(jnp.max(c, axis=2, keepdims=True))
    return c_att * f


if __name__ == "__main__":
    # Small shapes consistent with the module (N multiple of 128 -> lane-dense).
    B, N, C_P, C_I, H, W = 2, 256, 32, 4, 16, 16
    reduction = 4
    C_r = C_P // reduction

    key = jax.random.PRNGKey(0)
    keys = jax.random.split(key, 16)

    params = {
        "wf":  0.1 * jax.random.normal(keys[0], (C_P, C_P), jnp.float32),
        "bf":  0.05 * jax.random.normal(keys[1], (C_P,), jnp.float32),
        "bn_gamma": 1.0 + 0.1 * jax.random.normal(keys[2], (C_P,), jnp.float32),
        "bn_beta":  0.1 * jax.random.normal(keys[3], (C_P,), jnp.float32),
        "bn_mean":  0.05 * jax.random.normal(keys[4], (C_P,), jnp.float32),
        "bn_var":   jnp.abs(1.0 + 0.1 * jax.random.normal(keys[5], (C_P,), jnp.float32)),
        "ws":  0.1 * jax.random.normal(keys[6], (C_r, C_P), jnp.float32),
        "bs":  0.05 * jax.random.normal(keys[7], (C_r,), jnp.float32),
        "wc1": 0.1 * jax.random.normal(keys[8], (C_r, C_P), jnp.float32),
        "bc1": 0.05 * jax.random.normal(keys[9], (C_r,), jnp.float32),
        "wc2": 0.1 * jax.random.normal(keys[10], (C_P, C_r), jnp.float32),
        "bc2": 0.05 * jax.random.normal(keys[11], (C_P,), jnp.float32),
    }

    pts_img = jax.random.uniform(keys[12], (B, N, 2), jnp.float32)
    img_feats = jax.random.normal(keys[13], (B, C_I, H, W), jnp.float32)
    pts_feats = jax.random.normal(keys[14], (B, C_P, N), jnp.float32)

    ref = ref_forward(pts_feats, params)

    # 1) f32 single-pass path: strict check (validates kernel math / BN folding).
    out_f32 = pointwise_gate3(pts_img, img_feats, pts_feats, params,
                              compute_dtype=jnp.float32)
    out_f32 = jax.block_until_ready(out_f32)
    np.testing.assert_allclose(np.asarray(out_f32), np.asarray(ref),
                               rtol=1e-5, atol=1e-5)

    # 2) bf16-I/O path (production default): loose check vs the f32 reference.
    out_bf16 = pointwise_gate3(pts_img, img_feats, pts_feats, params)
    out_bf16 = jax.block_until_ready(out_bf16)
    np.testing.assert_allclose(np.asarray(out_bf16), np.asarray(ref),
                               rtol=5e-2, atol=5e-2)

    # 3) forced two-pass N-tiled path with non-128 N (exercises padding + mask).
    N2 = 250
    pts_feats2 = jax.random.normal(keys[15], (B, C_P, N2), jnp.float32)
    ref2 = ref_forward(pts_feats2, params)
    out2 = pointwise_gate3(None, None, pts_feats2, params,
                           compute_dtype=jnp.float32,
                           force_two_pass=True, n_tile=128)
    out2 = jax.block_until_ready(out2)
    np.testing.assert_allclose(np.asarray(out2), np.asarray(ref2),
                               rtol=1e-5, atol=1e-5)

    print("KERNEL_OK")
</pallas_src>

<mosaic_0001>
module attributes {stable_mosaic.version = 11 : i64} {
  func.func @kernel(%arg0: i32, %arg1: memref<1x32x256xf32, #tpu.memory_space<vmem>>, %arg2: memref<32x32xf32, #tpu.memory_space<vmem>>, %arg3: memref<32x1xf32, #tpu.memory_space<vmem>>, %arg4: memref<16x32xf32, #tpu.memory_space<vmem>>, %arg5: memref<8x1xf32, #tpu.memory_space<vmem>>, %arg6: memref<8x1xf32, #tpu.memory_space<vmem>>, %arg7: memref<32x8xf32, #tpu.memory_space<vmem>>, %arg8: memref<32x1xf32, #tpu.memory_space<vmem>>, %arg9: memref<1x32x256xf32, #tpu.memory_space<vmem>>) attributes {dimension_semantics = [#tpu.dimension_semantics<parallel>], iteration_bounds = array<i64: 2>, scalar_prefetch = 0 : i64, scratch_operands = 0 : i64, tpu.core_type = #tpu.core_type<tc>, window_params = [{transform_indices = @transform_0, window_bounds = array<i64: 1, 32, 256>}, {pipeline_mode = #tpu.pipeline_mode<synchronous>, transform_indices = @transform_1, window_bounds = array<i64: 32, 32>}, {pipeline_mode = #tpu.pipeline_mode<synchronous>, transform_indices = @transform_2, window_bounds = array<i64: 32, 1>}, {pipeline_mode = #tpu.pipeline_mode<synchronous>, transform_indices = @transform_3, window_bounds = array<i64: 16, 32>}, {pipeline_mode = #tpu.pipeline_mode<synchronous>, transform_indices = @transform_4, window_bounds = array<i64: 8, 1>}, {pipeline_mode = #tpu.pipeline_mode<synchronous>, transform_indices = @transform_5, window_bounds = array<i64: 8, 1>}, {pipeline_mode = #tpu.pipeline_mode<synchronous>, transform_indices = @transform_6, window_bounds = array<i64: 32, 8>}, {pipeline_mode = #tpu.pipeline_mode<synchronous>, transform_indices = @transform_7, window_bounds = array<i64: 32, 1>}, {transform_indices = @transform_8, window_bounds = array<i64: 1, 32, 256>}]} {
    %c0 = arith.constant 0 : index
    %c0_0 = arith.constant 0 : index
    %c0_1 = arith.constant 0 : index
    %0 = vector.load %arg1[%c0, %c0_0, %c0_1] : memref<1x32x256xf32, #tpu.memory_space<vmem>>, vector<1x32x256xf32>
    %1 = vector.shape_cast %0 : vector<1x32x256xf32> to vector<32x256xf32>
    %c0_2 = arith.constant 0 : index
    %c0_3 = arith.constant 0 : index
    %2 = vector.load %arg2[%c0_2, %c0_3] : memref<32x32xf32, #tpu.memory_space<vmem>>, vector<32x32xf32>
    %cst = arith.constant dense<0.000000e+00> : vector<32x256xf32>
    %3 = tpu.matmul %2, %1, %cst {dimension_numbers = #tpu.dot_dimension_numbers<[1], [0], [0], [1], [0, 0, 1, 1], [], []>} : vector<32x32xf32>, vector<32x256xf32>, vector<32x256xf32> -> vector<32x256xf32>
    %c0_4 = arith.constant 0 : index
    %c0_5 = arith.constant 0 : index
    %4 = vector.load %arg3[%c0_4, %c0_5] : memref<32x1xf32, #tpu.memory_space<vmem>>, vector<32x1xf32>
    %5 = vector.broadcast %4 : vector<32x1xf32> to vector<32x256xf32>
    %6 = arith.addf %3, %5 : vector<32x256xf32>
    %cst_6 = arith.constant 0.000000e+00 : f32
    %7 = vector.broadcast %cst_6 : f32 to vector<32x256xf32>
    %8 = arith.maximumf %6, %7 : vector<32x256xf32>
    %c0_7 = arith.constant 0 : index
    %c0_8 = arith.constant 0 : index
    %9 = vector.load %arg4[%c0_7, %c0_8] : memref<16x32xf32, #tpu.memory_space<vmem>>, vector<16x32xf32>
    %cst_9 = arith.constant dense<0.000000e+00> : vector<16x256xf32>
    %10 = tpu.matmul %9, %8, %cst_9 {dimension_numbers = #tpu.dot_dimension_numbers<[1], [0], [0], [1], [0, 0, 1, 1], [], []>} : vector<16x32xf32>, vector<32x256xf32>, vector<16x256xf32> -> vector<16x256xf32>
    %11 = vector.extract_strided_slice %10 {offsets = [0, 0], sizes = [8, 256], strides = [1, 1]} : vector<16x256xf32> to vector<8x256xf32>
    %c0_10 = arith.constant 0 : index
    %c0_11 = arith.constant 0 : index
    %12 = vector.load %arg5[%c0_10, %c0_11] : memref<8x1xf32, #tpu.memory_space<vmem>>, vector<8x1xf32>
    %13 = vector.broadcast %12 : vector<8x1xf32> to vector<8x256xf32>
    %14 = arith.addf %11, %13 : vector<8x256xf32>
    %cst_12 = arith.constant dense<0xFF800000> : vector<256xf32>
    %15 = vector.multi_reduction <maximumf>, %14, %cst_12 [0] : vector<8x256xf32> to vector<256xf32>
    %16 = vector.shape_cast %15 : vector<256xf32> to vector<1x256xf32>
    %17 = arith.negf %16 : vector<1x256xf32>
    %18 = math.exp %17 : vector<1x256xf32>
    %cst_13 = arith.constant 1.000000e+00 : f32
    %19 = vector.broadcast %cst_13 : f32 to vector<1x256xf32>
    %20 = arith.addf %19, %18 : vector<1x256xf32>
    %21 = arith.divf %19, %20 : vector<1x256xf32>
    %22 = vector.extract_strided_slice %10 {offsets = [8, 0], sizes = [8, 256], strides = [1, 1]} : vector<16x256xf32> to vector<8x256xf32>
    %23 = vector.broadcast %21 : vector<1x256xf32> to vector<8x256xf32>
    %24 = arith.mulf %23, %22 : vector<8x256xf32>
    %c0_14 = arith.constant 0 : index
    %c0_15 = arith.constant 0 : index
    %25 = vector.load %arg6[%c0_14, %c0_15] : memref<8x1xf32, #tpu.memory_space<vmem>>, vector<8x1xf32>
    %26 = vector.broadcast %25 : vector<8x1xf32> to vector<8x256xf32>
    %27 = arith.addf %24, %26 : vector<8x256xf32>
    %cst_16 = arith.constant 0.000000e+00 : f32
    %28 = vector.broadcast %cst_16 : f32 to vector<8x256xf32>
    %29 = arith.maximumf %27, %28 : vector<8x256xf32>
    %c0_17 = arith.constant 0 : index
    %c0_18 = arith.constant 0 : index
    %30 = vector.load %arg7[%c0_17, %c0_18] : memref<32x8xf32, #tpu.memory_space<vmem>>, vector<32x8xf32>
    %cst_19 = arith.constant dense<0.000000e+00> : vector<32x256xf32>
    %31 = tpu.matmul %30, %29, %cst_19 {dimension_numbers = #tpu.dot_dimension_numbers<[1], [0], [0], [1], [0, 0, 1, 1], [], []>} : vector<32x8xf32>, vector<8x256xf32>, vector<32x256xf32> -> vector<32x256xf32>
    %c0_20 = arith.constant 0 : index
    %c0_21 = arith.constant 0 : index
    %32 = vector.load %arg8[%c0_20, %c0_21] : memref<32x1xf32, #tpu.memory_space<vmem>>, vector<32x1xf32>
    %33 = vector.broadcast %32 : vector<32x1xf32> to vector<32x256xf32>
    %34 = arith.addf %31, %33 : vector<32x256xf32>
    %cst_22 = arith.constant dense<0xFF800000> : vector<32xf32>
    %35 = vector.multi_reduction <maximumf>, %34, %cst_22 [1] : vector<32x256xf32> to vector<32xf32>
    %36 = vector.shape_cast %35 : vector<32xf32> to vector<32x1xf32>
    %37 = arith.negf %36 : vector<32x1xf32>
    %38 = math.exp %37 : vector<32x1xf32>
    %cst_23 = arith.constant 1.000000e+00 : f32
    %39 = vector.broadcast %cst_23 : f32 to vector<32x1xf32>
    %40 = arith.addf %39, %38 : vector<32x1xf32>
    %41 = arith.divf %39, %40 : vector<32x1xf32>
    %42 = vector.broadcast %21 : vector<1x256xf32> to vector<32x256xf32>
    %43 = arith.mulf %42, %8 : vector<32x256xf32>
    %44 = vector.broadcast %41 : vector<32x1xf32> to vector<32x256xf32>
    %45 = arith.mulf %44, %43 : vector<32x256xf32>
    %c0_24 = arith.constant 0 : index
    %c0_25 = arith.constant 0 : index
    %c0_26 = arith.constant 0 : index
    %46 = vector.load %arg9[%c0_24, %c0_25, %c0_26] : memref<1x32x256xf32, #tpu.memory_space<vmem>>, vector<1x32x256xf32>
    %47 = vector.shape_cast %46 : vector<1x32x256xf32> to vector<32x256xf32>
    %48 = vector.shape_cast %45 : vector<32x256xf32> to vector<1x32x256xf32>
    tpu.vector_store %arg9[%c0_24, %c0_25, %c0_26], %48 {strides = array<i32>} : memref<1x32x256xf32, #tpu.memory_space<vmem>>, vector<1x32x256xf32>,
    return
  }
  func.func @transform_0(%arg0: i32) -> (i32, i32, i32) {
    %c0_i32 = arith.constant 0 : i32
    %c0_i32_0 = arith.constant 0 : i32
    %c0_i32_1 = arith.constant 0 : i32
    return %arg0, %c0_i32, %c0_i32_0 : i32, i32, i32
  }
  func.func @transform_1(%arg0: i32) -> (i32, i32) {
    %c0_i32 = arith.constant 0 : i32
    %c0_i32_0 = arith.constant 0 : i32
    %c0_i32_1 = arith.constant 0 : i32
    return %c0_i32, %c0_i32_0 : i32, i32
  }
  func.func @transform_2(%arg0: i32) -> (i32, i32) {
    %c0_i32 = arith.constant 0 : i32
    %c0_i32_0 = arith.constant 0 : i32
    %c0_i32_1 = arith.constant 0 : i32
    return %c0_i32, %c0_i32_0 : i32, i32
  }
  func.func @transform_3(%arg0: i32) -> (i32, i32) {
    %c0_i32 = arith.constant 0 : i32
    %c0_i32_0 = arith.constant 0 : i32
    %c0_i32_1 = arith.constant 0 : i32
    return %c0_i32, %c0_i32_0 : i32, i32
  }
  func.func @transform_4(%arg0: i32) -> (i32, i32) {
    %c0_i32 = arith.constant 0 : i32
    %c0_i32_0 = arith.constant 0 : i32
    %c0_i32_1 = arith.constant 0 : i32
    return %c0_i32, %c0_i32_0 : i32, i32
  }
  func.func @transform_5(%arg0: i32) -> (i32, i32) {
    %c0_i32 = arith.constant 0 : i32
    %c0_i32_0 = arith.constant 0 : i32
    %c0_i32_1 = arith.constant 0 : i32
    return %c0_i32, %c0_i32_0 : i32, i32
  }
  func.func @transform_6(%arg0: i32) -> (i32, i32) {
    %c0_i32 = arith.constant 0 : i32
    %c0_i32_0 = arith.constant 0 : i32
    %c0_i32_1 = arith.constant 0 : i32
    return %c0_i32, %c0_i32_0 : i32, i32
  }
  func.func @transform_7(%arg0: i32) -> (i32, i32) {
    %c0_i32 = arith.constant 0 : i32
    %c0_i32_0 = arith.constant 0 : i32
    %c0_i32_1 = arith.constant 0 : i32
    return %c0_i32, %c0_i32_0 : i32, i32
  }
  func.func @transform_8(%arg0: i32) -> (i32, i32, i32) {
    %c0_i32 = arith.constant 0 : i32
    %c0_i32_0 = arith.constant 0 : i32
    %c0_i32_1 = arith.constant 0 : i32
    return %arg0, %c0_i32, %c0_i32_0 : i32, i32, i32
  }
}

</mosaic_0001>

<bundles_post_ra>
// kernel: tpu_custom_call.1
= control target key start
LH: loop header
LB: loop body
LE: loop exit
PB: predicated region body
PF: predicated region fallthrough
CT: control target
= control target key end

     0   :  { %13 = vsyncpa [#allocation3], 0  ;;  %s1469_s0 = inlined_call_operand.hbm [shape: f32[2,32,256], index: 0, kind: input, shape index: {}]   ;;  %s1470_s1 = inlined_call_operand.vmem [shape: f32[32,32], index: 1, kind: input, shape index: {}]   ;;  %s1471_s2 = inlined_call_operand.vmem [shape: f32[32,1], index: 2, kind: input, shape index: {}]   ;;  %s1472_s3 = inlined_call_operand.vmem [shape: f32[16,32], index: 3, kind: input, shape index: {}]   ;;  %s1473_s4 = inlined_call_operand.vmem [shape: f32[8,1], index: 4, kind: input, shape index: {}]   ;;  %s1474_s5 = inlined_call_operand.vmem [shape: f32[8,1], index: 5, kind: input, shape index: {}]   ;;  %s1475_s6 = inlined_call_operand.vmem [shape: f32[32,8], index: 6, kind: input, shape index: {}]   ;;  %s1476_s7 = inlined_call_operand.vmem [shape: f32[32,1], index: 7, kind: input, shape index: {}]   ;;  %s1477_s8 = inlined_call_operand.hbm [shape: f32[2,32,256], index: 8, kind: output, shape index: {}]  }
   0x1   :  { %15 = vsyncpa [#allocation3 + $0x1], 0 }
   0x2   :  { %16 = vsyncpa [#allocation4], 0 }
   0x3   :  { %18 = vsyncpa [#allocation4 + $0x1], 0  ;;  %s1157_s27 = smov 0   ;;  %s1159_s28 = smov 0  }
   0x4   :  { %s1161_s29 = smov 0   ;;  %s1163_s30 = smov 0  }
   0x5 LB: > { %s1178_s9 = sadd.s32 4294967295, %s1102_s30   ;;  %s876_s10 = sadd.s32 4294967294, %s1102_s30   ;;  %s1102_s30 = sphi %s1163_s30, %s1490_s30   ;;  %s1098_s29 = sphi %s1161_s29, %s1489_s29   ;;  %s1094_s28 = sphi %s1159_s28, %s1488_s28   ;;  %s1090_s27 = sphi %s1157_s27, %s1487_s27  }
   0x6   : > { %s1182_s11 = sadd.s32 1, %s1102_s30   ;;  %s31_s12 = sadd.s32 1, %s1098_s29 }
   0x7   : > { %s28_s13 = ssub.s32 %s1102_s30, %s1182_s11  ;;  %p38_p0 = scmp.ne.s32.totalorder %s1098_s29, %s1094_s28 }
   0x8   : > { %p29_p1 = scmp.eq.s32.totalorder %s28_s13, 0  ;;  %p39_p2 = scmp.eq.s32.totalorder %s1102_s30, 0 }
   0x9   : > { %p44_p3 = scmp.ne.s32.totalorder %s1094_s28, %s1090_s27  ;;  %p45_p4 = scmp.eq.s32.totalorder %s1178_s9, 0 }
   0xa   : > { %s1194_s14 = scalar_select %p29_p1, %s1098_s29, %s31_s12  }
   0xb   : > { %p1196_p5 = por %p39_p2, %p38_p0  ;;  %p1200_p6 = por %p45_p4, %p44_p3 }
   0xc   : > { %p215_p7 = scmp.eq.s32.totalorder %s1178_s9, 1  ;;  %p221_p8 = scmp.eq.s32.totalorder %s876_s10, 1 }
   0xd   : > { %p940_p10 = scmp.lt.s32.totalorder %s1102_s30, 2  ;;  %s262_s19 = sand.u32 1, %s1098_s29  }
   0xe   : > { %p1207_p11 = por %p215_p7, %p38_p0  ;;  %p1211_p12 = por %p221_p8, %p44_p3 }
   0xf   : > { %s906_s20 = sshll.u32 %s1102_s30, 10  ;;  %s879_s21 = sshll.u32 %s262_s19, 6 }
  0x10   : > { %s1481_s17 = scalar_select %p1207_p11, 1, 0 }
  0x11   : > { %s1482_s18 = scalar_select %p1211_p12, 1, 0 }
  0x12   : > { %s1220_s24 = scalar_lea.hbm %s1469_s0, %s906_s20  ;;  %s266_s25 = scalar_lea.vmem [#allocation2], %s879_s21 }
  0x13   : > { %s273_s26 = sshll.u32 %s266_s25, 4  ;;  %p1224_p13 = pnand %p940_p10, %p1196_p5  ;;  %s1228_s26 = int_to_ptr.vmem [resolvable:$true] %s273_s26 }
  0x14   : > { %s1230_s12 = scalar_lea.sflag [#allocation3], %s262_s19  ;;  %s1006_s13 = scalar_lea.hbm %s1220_s24, 1024 }
  0x15   : > { %p1007_p0 = scmp.ne.s32.totalorder %s1220_s24, %s1006_s13  ;;  %p1008_p1 = pneg %p1224_p13 }
  0x16   : > { %s1011_s21 = scalar_lea.hbm %s1469_s0, 2048  ;;  %p1012_p4 = scmp.lt.u32.totalorder %s1220_s24, %s1469_s0 }
  0x17   : > { %p1009_p2 = pnand %p1008_p1, %p1007_p0  ;;  %p1013_p5 = scmp.lt.u32.totalorder %s1011_s21, %s1006_s13 }
  0x18   : > { %p1015_p8 = scmp.lt.u32.totalorder %s1006_s13, %s1220_s24 }
  0x19   : > { %p1010_p3 = pneg %p1009_p2  ;;  %p1014_p7 = por %p1013_p5, %p1012_p4 }
  0x1b   : > { %p1016_p10 = por %p1015_p8, %p1014_p7 }
  0x1d   : > { %p1017_p9 = pnand %p1016_p10, %p1010_p3 }
  0x1f   : > { %1020 = shalt.err (!%p1017_p9)
}
  0x20   : > { %s1021_s19 = scalar_lea.vmem %s1228_s26, 1024  ;;  %s1104_s25 = smov [#allocation2]  }
  0x21   : > { %p1022_p0 = scmp.ne.s32.totalorder %s1228_s26, %s1021_s19  ;;  %s1026_s20 = sshll.u32 %s1104_s25, 4  ;;  %s1027_s20 = int_to_ptr.vmem [resolvable:$false] %s1026_s20 }
  0x22   : > { %s1028_s15 = scalar_lea.vmem %s1027_s20, 2048  ;;  %p1029_p11 = scmp.lt.s32.totalorder %s1228_s26, %s1027_s20 }
  0x23   : > { %p1024_p2 = pnand %p1022_p0, %p1008_p1  ;;  %p1030_p4 = scmp.lt.s32.totalorder %s1028_s15, %s1021_s19 }
  0x25   : > { %p1025_p12 = pneg %p1024_p2  ;;  %p1031_p5 = por %p1030_p4, %p1029_p11 }
  0x27   : > { %p1032_p7 = pnand %p1031_p5, %p1025_p12 }
  0x29   : > { %1035 = shalt.err (!%p1032_p7)
}
  0x2a   : > { %s1105_s13 = smov 256   ;;  %s1106_s21 = smov 16  }
  0x2b   : > { %935 = dma.hbm_to_vmem [thread:$0]  (!%p1224_p13), %s1220_s24, 1024, %s1228_s26, %s1230_s12, %s1105_s13, %s1105_s13, %s1106_s21  }
  0x2c   : > { %p882_p9 = scmp.ge.s32.totalorder %s1102_s30, 1  ;;  %p281_p1 = scmp.lt.s32.totalorder %s1102_s30, 3 }
  0x2e   : > { %p282_p3 = pnand %p882_p9, %p281_p1 }
  0x2f   : > { %s1261_s22 = sand.u32 (!%p282_p3), 1, %s1094_s28  }
  0x30   : > { %285 = sbr.rel (%p282_p3) target bundleno = 977 (0x3d1), region = 52  ;;  %s883_s23 = sshll.u32 (!%p282_p3), %s1261_s22, 6 }
  0x31   : > { %s288_s19 = scalar_lea.sflag (!%p282_p3), [#allocation3], %s1261_s22  ;;  %s291_s25 = scalar_lea.vmem (!%p282_p3), [#allocation2], %s883_s23 }
  0x37   : > { %1081 = dma.done.wait (%p1200_p6), %s288_s19, 1024  }
  0x38   : > { %1083 = vsyncadd (%p1200_p6), %s288_s19, 4294966272  ;;  %v1107_v0 = vmov 0.0   ;;  %v1108_v1 = vmov 0   ;;  %v325_v2 = vld [vmem:[%s291_s25 + $0x8] sm:$0xff]  ;;  %v327_v3 = vld [vmem:[%s291_s25 + $0x18] sm:$0xff]  ;;  %vm360_vm0 = vcmask 261120  }
  0x39   : > { %437 = vmatprep.mubr.f32.mxu0 %v1107_v0  ;;  %980 = vset.pattern.permute.xlu0 %v1108_v1  ;;  %v324_v4 = vld [vmem:[%s291_s25] sm:$0xff]  ;;  %v908_v5 = vpack.c.bf16 %v327_v3, %v325_v2  ;;  %v326_v6 = vld [vmem:[%s291_s25 + $0x10] sm:$0xff]  ;;  %v329_v7 = vld [vmem:[%s291_s25 + $0x28] sm:$0xff]  ;;  %vm627_vm1 = vcmask 64512   ;;  %s323_s13 = scalar_lea.vmem [#allocation5], %s883_s23  ;;  %s907_s23 = sshll.u32 %s1178_s9, 10 }
  0x3a   : > { %981 = vset.pattern.permute.xlu1 %v1108_v1  ;;  %548 = vmatprep.mubr.f32.mxu1 %v1107_v0  ;;  %v331_v8 = vld [vmem:[%s291_s25 + $0x38] sm:$0xff]  ;;  %v910_v9 = vpack.c.bf16 %v326_v6, %v324_v4  ;;  %v328_v11 = vld [vmem:[%s291_s25 + $0x20] sm:$0xff]  ;;  %v330_v12 = vld [vmem:[%s291_s25 + $0x30] sm:$0xff]  ;;  %s803_s21 = sshll.u32 %s323_s13, 4  ;;  %s1423_s16 = scalar_lea.hbm %s1477_s8, %s907_s23  ;;  %s1425_s21 = int_to_ptr.vmem [resolvable:$true] %s803_s21 }
  0x3b   : > { %v912_v10 = vpack.c.bf16 %v331_v8, %v329_v7  ;;  %909 = vmatprep.subr.bf16.mxu0 %v908_v5  ;;  %v914_v13 = vpack.c.bf16 %v330_v12, %v328_v11  ;;  %v336_v14 = vld [vmem:[%s1471_s2] sm:$0xff]  ;;  %v338_v15 = vld [vmem:[%s1471_s2 + $0x10] sm:$0xff]  ;;  %v337_v16 = vld [vmem:[%s1471_s2 + $0x8] sm:$0xff]  ;;  %s790_s9 = scalar_lea.sflag [#allocation4], %s1261_s22  ;;  %s1036_s24 = scalar_lea.vmem %s1425_s21, 1024 }
  0x3c   : > { %911 = vmatpush1.bf16.msra.mxu0 %v910_v9  ;;  %342 = vperm.xlu0 %980, %v336_v14   ;;  %v339_v17 = vld [vmem:[%s1471_s2 + $0x18] sm:$0xff]  ;;  %v332_v18 = vld [vmem:[%s1470_s1] sm:$0xff]  ;;  %v333_v21 = vld [vmem:[%s1470_s1 + $0x8] sm:$0xff]  ;;  %p1037_p6 = scmp.ne.s32.totalorder %s1425_s21, %s1036_s24  ;;  %p1484_p11 = scmp.ne.s32.totalorder %s1481_s17, 0 }
  0x3d   : > { %913 = vmatprep.subr.bf16.mxu0 %v912_v10  ;;  %352 = vperm.xlu1 %981, %v338_v15   ;;  %v555_v19 = vld [vmem:[%s1473_s4] sm:$0xff]  ;;  %v604_v23 = vld [vmem:[%s1476_s7 + $0x8] sm:$0xff]  ;;  %v334_v24 = vld [vmem:[%s1470_s1 + $0x10] sm:$0xff]  ;;  %s1109_s26 = smov [#allocation5]  }
  0x3e   : > { %v589_v20 = vld [vmem:[%s1474_s5] sm:$0xff]  ;;  %v605_v25 = vld [vmem:[%s1476_s7 + $0x10] sm:$0xff]  ;;  %v606_v26 = vld [vmem:[%s1476_s7 + $0x18] sm:$0xff]  ;;  %p1038_p12 = pnand %p1037_p6, %p1484_p11  ;;  %s1040_s10 = sshll.u32 %s1109_s26, 4  ;;  %s1041_s10 = int_to_ptr.vmem [resolvable:$false] %s1040_s10 }
  0x3f   : > { %v603_v22 = vld [vmem:[%s1476_s7] sm:$0xff]  ;;  %v335_v27 = vld [vmem:[%s1470_s1 + $0x18] sm:$0xff]  ;;  %v471_v61 = vld [vmem:[%s1472_s3 + $0x8] sm:$0xff]  ;;  %s1042_s12 = scalar_lea.vmem %s1041_s10, 2048  ;;  %p1043_p8 = scmp.lt.s32.totalorder %s1425_s21, %s1041_s10 }
  0x40   : > { %915 = vmatpush1.bf16.msra.mxu0 %v914_v13  ;;  %347 = vperm.xlu0 %980, %v337_v16   ;;  %v470_v60 = vld [vmem:[%s1472_s3] sm:$0xff]  ;;  %p1039_p13 = pneg %p1038_p12  ;;  %p1044_p10 = scmp.lt.s32.totalorder %s1042_s12, %s1036_s24 }
  0x41   : > { %357 = vperm.xlu1 %981, %v339_v17  }
  0x42   : > { %p1045_p0 = por %p1044_p10, %p1043_p8 }
  0x43   : > { %885 = vmatmul.mubr.msk.f32.vlgmr.msra.gmra.mrb[0].mxu0 %vm360_vm0, %v332_v18 }
  0x44   : > { %443 = vmatprep.mubr.f32.mxu0 %v1107_v0  ;;  %558 = vperm.xlu0 %980, %v555_v19   ;;  %p1046_p2 = pnand %p1045_p0, %p1039_p13 }
  0x45   : > { %592 = vperm.xlu1 %981, %v589_v20  }
  0x47   : > { %886 = vmatmul.mubr.msk.f32.gmra.mrb[2].mxu0 %vm360_vm0, %v333_v21 }
  0x48   : > { %449 = vmatprep.mubr.f32.mxu0 %v1107_v0  ;;  %609 = vperm.xlu0 %980, %v603_v22  }
  0x49   : > { %614 = vperm.xlu1 %981, %v604_v23  }
  0x4b   : > { %887 = vmatmul.mubr.msk.f32.gmra.mrb[4].mxu0 %vm360_vm0, %v334_v24 }
  0x4c   : > { %455 = vmatprep.mubr.f32.mxu0 %v1107_v0  ;;  %619 = vperm.xlu0 %980, %v605_v25  }
  0x4d   : > { %624 = vperm.xlu1 %981, %v606_v26  }
  0x4f   : > { %888 = vmatmul.mubr.msk.f32.gmra.mrb[6].mxu0 %vm360_vm0, %v335_v27 }
  0x50   : > { %542 = vmatprep.mubr.f32.mxu0 %v1107_v0 }
  0xbb   : > { %v343_v28 = vpop.permute.xlu0 %342 }
  0xbc   : > { %v353_v37 = vpop.permute.xlu1 %352 }
  0xbf   : > { %v348_v31 = vpop.permute.xlu0 %347 }
  0xc0   : > { %v358_v47 = vpop.permute.xlu1 %357 }
  0xc3   : > { %v559_v62 = vpop.permute.xlu0 %558 }
  0xc4   : > { %v593_v27 = vpop.permute.xlu1 %592 }
 0x116   : > { %v439_v29 = vpop.f32.mrb[0].mxu0 }
 0x117   : > { %v441_v30 = vpop.f32.mrb[1].mxu0  ;;  %v1325_v34 = vadd.f32 %v439_v29, %v343_v28 }
 0x118   : > { %v1323_v32 = vadd.f32 %v441_v30, %v343_v28 }
 0x119   : > { %v462_v43 = vmax.f32 %v1325_v34, 0.0 }
 0x11a   : > { %v445_v33 = vpop.f32.mrb[2].mxu0  ;;  %v463_v40 = vmax.f32 %v1323_v32, 0.0 }
 0x11b   : > { %v1327_v35 = vadd.f32 %v445_v33, %v348_v31  ;;  %v447_v36 = vpop.f32.mrb[3].mxu0 }
 0x11c   : > { %v1329_v38 = vadd.f32 %v447_v36, %v348_v31  ;;  %v599_v36 = vld [vmem:[%s1475_s6] sm:$0xff] }
 0x11d   : > { %v464_v39 = vmax.f32 %v1327_v35, 0.0 }
 0x11e   : > { %v465_v41 = vmax.f32 %v1329_v38, 0.0  ;;  %v451_v42 = vpop.f32.mrb[4].mxu0 }
 0x11f   : > { %v453_v44 = vpop.f32.mrb[5].mxu0  ;;  %v918_v46 = vpack.c.bf16 %v464_v39, %v462_v43  ;;  %v1345_v50 = vadd.f32 %v451_v42, %v353_v37  ;;  %v601_v42 = vld [vmem:[%s1475_s6 + $0x10] sm:$0xff] }
 0x120   : > { %v916_v45 = vpack.c.bf16 %v465_v41, %v463_v40  ;;  %v1343_v48 = vadd.f32 %v453_v44, %v353_v37  ;;  %v600_v37 = vld [vmem:[%s1475_s6 + $0x8] sm:$0xff]  ;;  %v602_v44 = vld [vmem:[%s1475_s6 + $0x18] sm:$0xff] }
 0x121   : > { %v466_v57 = vmax.f32 %v1345_v50, 0.0 }
 0x122   : > { %v457_v49 = vpop.f32.mrb[6].mxu0  ;;  %917 = vmatprep.subr.bf16.mxu0 %v916_v45  ;;  %924 = vmatprep.subr.bf16.mxu1 %v916_v45  ;;  %v467_v55 = vmax.f32 %v1343_v48, 0.0  ;;  %v610_v45 = vpop.permute.xlu0 %609 }
 0x123   : > { %v1347_v51 = vadd.f32 %v457_v49, %v358_v47  ;;  %v459_v52 = vpop.f32.mrb[7].mxu0  ;;  %919 = vmatpush1.bf16.msra.mxu0 %v918_v46  ;;  %926 = vmatpush1.bf16.msra.mxu1 %v918_v46 }
 0x124   : > { %v1349_v53 = vadd.f32 %v459_v52, %v358_v47 }
 0x125   : > { %v468_v54 = vmax.f32 %v1347_v51, 0.0 }
 0x126   : > { %v469_v56 = vmax.f32 %v1349_v53, 0.0 }
 0x127   : > { %v922_v59 = vpack.c.bf16 %v468_v54, %v466_v57 }
 0x128   : > { %v920_v58 = vpack.c.bf16 %v469_v56, %v467_v55 }
 0x12a   : > { %921 = vmatprep.subr.bf16.mxu0 %v920_v58  ;;  %925 = vmatprep.subr.bf16.mxu1 %v920_v58  ;;  %v615_v58 = vpop.permute.xlu1 %614 }
 0x12b   : > { %923 = vmatpush1.bf16.msra.mxu0 %v922_v59  ;;  %927 = vmatpush1.bf16.msra.mxu1 %v922_v59 }
 0x12e   : > { %889 = vmatmul.mubr.msk.f32.vlgmr.msra.gmra.mrb[8].mxu0 %vm360_vm0, %v470_v60  ;;  %890 = vmatmul.mubr.msk.f32.vlgmr.msra.gmra.mrb[0].mxu1 %vm360_vm0, %v471_v61 }
 0x12f   : > { %704 = vmatprep.mubr.f32.mxu1 %v1107_v0 }
 0x201   : > { %v544_v63 = vpop.f32.mrb[8].mxu0  ;;  %v550_v1 = vpop.f32.mrb[0].mxu1 }
 0x202   : > { %v561_v2 = vadd.f32 %v559_v62, %v544_v63  ;;  %v546_v3 = vpop.f32.mrb[9].mxu0  ;;  %v552_v4 = vpop.f32.mrb[1].mxu1 }
 0x203   : > { %v562_v5 = vadd.f32 %v559_v62, %v546_v3 }
 0x204   : > { %v563_v6 = vrot.slane %v561_v2, 4 }
 0x205   : > { %v569_v7 = vrot.slane %v562_v5, 4 }
 0x206   : > { %v564_v8 = vmax.f32 %v561_v2, %v563_v6  ;;  %v625_v6 = vpop.permute.xlu1 %624 }
 0x207   : > { %v570_v9 = vmax.f32 %v562_v5, %v569_v7 }
 0x208   : > { %v565_v10 = vrot.slane %v564_v8, 2 }
 0x209   : > { %v571_v11 = vrot.slane %v570_v9, 2 }
 0x20a   : > { %v566_v12 = vmax.f32 %v564_v8, %v565_v10 }
 0x20b   : > { %v572_v13 = vmax.f32 %v570_v9, %v571_v11 }
 0x20c   : > { %v567_v14 = vrot.slane %v566_v12, 1 }
 0x20d   : > { %v573_v15 = vrot.slane %v572_v13, 1 }
 0x20e   : > { %v568_v16 = vmax.f32 %v566_v12, %v567_v14 }
 0x20f   : > { %v574_v17 = vmax.f32 %v572_v13, %v573_v15 }
 0x210   : > { %v891_v18 = vmul.f32 -1.442695, %v568_v16 }
 0x211   : > { %v892_v19 = vmul.f32 -1.442695, %v574_v17 }
 0x212   : > { %982 = vpow2.f32 %v891_v18 }
 0x213   : > { %984 = vpow2.f32 %v892_v19 }
 0x21c   : > { %v983_v20 = vpop.eup %982 }
 0x21d   : > { %v985_v21 = vpop.eup %984  ;;  %v581_v22 = vadd.f32 1.0, %v983_v20 }
 0x21e   : > { %v582_v23 = vadd.f32 1.0, %v985_v21 }
 0x21f   : > { %986 = vrcp.f32 %v581_v22 }
 0x220   : > { %988 = vrcp.f32 %v582_v23 }
 0x229   : > { %v1372_v24 = vpop.eup %986 }
 0x22a   : > { %v1374_v25 = vpop.eup %988  ;;  %v587_v26 = vmul.f32 %v1372_v24, %v550_v1  ;;  %v620_v1 = vpop.permute.xlu0 %619  ;;  %v767_v34 = vmul.f32 %v1372_v24, %v464_v39  ;;  %v771_v38 = vmul.f32 %v1372_v24, %v468_v54 }
 0x22b   : > { %v588_v28 = vmul.f32 %v1374_v25, %v552_v4  ;;  %v768_v32 = vmul.f32 %v1374_v25, %v465_v41  ;;  %v772_v41 = vmul.f32 %v1374_v25, %v469_v56 }
 0x22c   : > { %v595_v29 = vadd.f32 %v593_v27, %v587_v26 }
 0x22d   : > { %v596_v30 = vadd.f32 %v593_v27, %v588_v28 }
 0x22e   : > { %v597_v33 = vmax.f32 %v595_v29, 0.0 }
 0x22f   : > { %v598_v31 = vmax.f32 %v596_v30, 0.0  ;;  %v765_v30 = vmul.f32 %v1372_v24, %v462_v43 }
 0x231   : > { %640 = vmatprep.subr.mxu1 %v598_v31  ;;  %v766_v31 = vmul.f32 %v1374_v25, %v463_v40 }
 0x232   : > { %641 = vmatpush1.msra.mxu1 %v597_v33 }
 0x233   : > { %893 = vmatmul.mubr.msk.f32.vlgmr.msra.gmra.mrb[2].mxu1 %vm627_vm1, %v599_v36 }
 0x234   : > { %710 = vmatprep.mubr.f32.mxu1 %v1107_v0 }
 0x237   : > { %894 = vmatmul.mubr.msk.f32.gmra.mrb[4].mxu1 %vm627_vm1, %v600_v37 }
 0x238   : > { %716 = vmatprep.mubr.f32.mxu1 %v1107_v0 }
 0x23b   : > { %895 = vmatmul.mubr.msk.f32.gmra.mrb[6].mxu1 %vm627_vm1, %v601_v42 }
 0x23c   : > { %722 = vmatprep.mubr.f32.mxu1 %v1107_v0 }
 0x23f   : > { %896 = vmatmul.mubr.msk.f32.gmra.mrb[8].mxu1 %vm627_vm1, %v602_v44 }
 0x306   : > { %v706_v46 = vpop.f32.mrb[2].mxu1 }
 0x307   : > { %v707_v47 = vadd.f32 %v706_v46, %v610_v45  ;;  %v708_v49 = vpop.f32.mrb[3].mxu1  ;;  %v770_v46 = vmul.f32 %v1374_v25, %v467_v55 }
 0x308   : > { %v709_v52 = vadd.f32 %v708_v49, %v610_v45  ;;  %v769_v45 = vmul.f32 %v1372_v24, %v466_v57 }
 0x30a   : > { %v712_v59 = vpop.f32.mrb[4].mxu1  ;;  %v729_v60 = vmax.f32 %v707_v47, %v709_v52 }
 0x30b   : > { %v713_v61 = vadd.f32 %v712_v59, %v615_v58  ;;  %v714_v62 = vpop.f32.mrb[5].mxu1 }
 0x30c   : > { %v715_v63 = vadd.f32 %v714_v62, %v615_v58  ;;  %730 = vmax.xlane.f32.xlu0 %v729_v60 }
 0x30e   : > { %v718_v2 = vpop.f32.mrb[6].mxu1  ;;  %v732_v0 = vmax.f32 %v713_v61, %v715_v63 }
 0x30f   : > { %v719_v3 = vadd.f32 %v718_v2, %v620_v1  ;;  %v720_v4 = vpop.f32.mrb[7].mxu1 }
 0x310   : > { %v721_v5 = vadd.f32 %v720_v4, %v620_v1  ;;  %733 = vmax.xlane.f32.xlu1 %v732_v0 }
 0x312   : > { %v724_v7 = vpop.f32.mrb[8].mxu1  ;;  %v735_v8 = vmax.f32 %v719_v3, %v721_v5 }
 0x313   : > { %v725_v9 = vadd.f32 %v724_v7, %v625_v6  ;;  %v726_v10 = vpop.f32.mrb[9].mxu1 }
 0x314   : > { %v727_v11 = vadd.f32 %v726_v10, %v625_v6  ;;  %736 = vmax.xlane.f32.xlu0 %v735_v8 }
 0x316   : > { %v738_v12 = vmax.f32 %v725_v9, %v727_v11 }
 0x318   : > { %739 = vmax.xlane.f32.xlu0 %v738_v12 }
 0x399   : > { %v731_v13 = vpop.xlane.xlu0 %730 }
 0x39a   : > { %v897_v14 = vmul.f32 -1.442695, %v731_v13 }
 0x39c   : > { %990 = vpow2.f32 %v897_v14 }
 0x39d   : > { %v734_v15 = vpop.xlane.xlu1 %733 }
 0x39e   : > { %v898_v16 = vmul.f32 -1.442695, %v734_v15 }
 0x3a0   : > { %992 = vpow2.f32 %v898_v16 }
 0x3a1   : > { %v737_v17 = vpop.xlane.xlu0 %736 }
 0x3a2   : > { %v899_v18 = vmul.f32 -1.442695, %v737_v17 }
 0x3a4   : > { %994 = vpow2.f32 %v899_v18 }
 0x3a5   : > { %v740_v19 = vpop.xlane.xlu0 %739 }
 0x3a6   : > { %v991_v20 = vpop.eup %990  ;;  %v900_v21 = vmul.f32 -1.442695, %v740_v19 }
 0x3a7   : > { %v753_v22 = vadd.f32 1.0, %v991_v20 }
 0x3a8   : > { %996 = vpow2.f32 %v900_v21 }
 0x3a9   : > { %998 = vrcp.f32 %v753_v22 }
 0x3aa   : > { %v993_v23 = vpop.eup %992 }
 0x3ab   : > { %v754_v26 = vadd.f32 1.0, %v993_v23 }
 0x3ad   : > { %1000 = vrcp.f32 %v754_v26 }
 0x3ae   : > { %v995_v27 = vpop.eup %994 }
 0x3af   : > { %v755_v28 = vadd.f32 1.0, %v995_v27 }
 0x3b1   : > { %1002 = vrcp.f32 %v755_v28 }
 0x3b2   : > { %v997_v29 = vpop.eup %996 }
 0x3b3   : > { %v999_v33 = vpop.eup %998  ;;  %v756_v36 = vadd.f32 1.0, %v997_v29 }
 0x3b4   : > { %v773_v37 = vmul.f32 %v999_v33, %v765_v30  ;;  %v774_v42 = vmul.f32 %v999_v33, %v766_v31 }
 0x3b5   : > { %1004 = vrcp.f32 %v756_v36 }
 0x3b6   : > { %781 = vst [vmem:[%s323_s13] sm:$0xff] %v773_v37  ;;  %782 = vst [vmem:[%s323_s13 + $0x8] sm:$0xff] %v774_v42 }
 0x3b7   : > { %v1001_v43 = vpop.eup %1000 }
 0x3b8   : > { %v775_v40 = vmul.f32 %v1001_v43, %v767_v34  ;;  %v776_v44 = vmul.f32 %v1001_v43, %v768_v32 }
 0x3ba   : > { %783 = vst [vmem:[%s323_s13 + $0x10] sm:$0xff] %v775_v40  ;;  %784 = vst [vmem:[%s323_s13 + $0x18] sm:$0xff] %v776_v44 }
 0x3bb   : > { %v1003_v35 = vpop.eup %1002 }
 0x3bc   : > { %v777_v39 = vmul.f32 %v1003_v35, %v769_v45  ;;  %v778_v47 = vmul.f32 %v1003_v35, %v770_v46 }
 0x3be   : > { %785 = vst [vmem:[%s323_s13 + $0x20] sm:$0xff] %v777_v39  ;;  %786 = vst [vmem:[%s323_s13 + $0x28] sm:$0xff] %v778_v47 }
 0x3bf   : > { %v1005_v48 = vpop.eup %1004 }
 0x3c0   : > { %v779_v50 = vmul.f32 %v1005_v48, %v771_v38  ;;  %v780_v55 = vmul.f32 %v1005_v48, %v772_v41 }
 0x3c2   : > { %787 = vst [vmem:[%s323_s13 + $0x30] sm:$0xff] %v779_v50  ;;  %788 = vst [vmem:[%s323_s13 + $0x38] sm:$0xff] %v780_v55 }
 0x3c3   : > { %1049 = shalt.err (!%p1046_p2)
}
 0x3c4   : > { %s1050_s20 = scalar_lea.hbm %s1423_s16, 1024  ;;  %s1054_s23 = scalar_lea.hbm %s1477_s8, 2048 }
 0x3c5   : > { %p1051_p4 = scmp.ne.s32.totalorder %s1423_s16, %s1050_s20  ;;  %p1055_p9 = scmp.lt.u32.totalorder %s1423_s16, %s1477_s8 }
 0x3c6   : > { %p1056_p1 = scmp.lt.u32.totalorder %s1054_s23, %s1050_s20  ;;  %p1058_p6 = scmp.lt.u32.totalorder %s1050_s20, %s1423_s16 }
 0x3c7   : > { %p1052_p5 = pnand %p1051_p4, %p1484_p11 }
 0x3c8   : > { %p1057_p3 = por %p1056_p1, %p1055_p9 }
 0x3c9   : > { %p1053_p7 = pneg %p1052_p5 }
 0x3ca   : > { %p1059_p12 = por %p1058_p6, %p1057_p3 }
 0x3cc   : > { %p1060_p13 = pnand %p1059_p12, %p1053_p7 }
 0x3ce   : > { %1063 = shalt.err (!%p1060_p13)
}
 0x3cf   : > { %s1110_s24 = smov 256   ;;  %s1111_s26 = smov 16  }
 0x3d0   : > { %930 = dma.vmem_to_hbm [thread:$0]  (%p1484_p11), %s1425_s21, 1024, %s1423_s16, %s790_s9, %s1110_s24, %s1110_s24, %s1111_s26  }
 0x3d1 PF: > { %s818_s10 = sand.u32 1, %s1090_s27   ;;  %p1485_p8 = scmp.ne.s32.totalorder %s1482_s18, 0 }
 0x3d2   : > { %p1486_p10 = scmp.ge.s32.totalorder %s1102_s30, 2  ;;  %s819_s12 = scalar_lea.sflag [#allocation4], %s818_s10 }
 0x3d4   : > { %p937_p0 = pnand %p1486_p10, %p1485_p8 }
 0x3d6   : > { %1085 = dma.done.wait (!%p937_p0), %s819_s12, 1024  }
 0x3d7   : > { %1087 = vsyncadd (!%p937_p0), %s819_s12, 4294966272  ;;  %p21_p2 = scmp.ge.s32.totalorder %s1182_s11, 4   ;;  %s1487_s27 = smov %s1094_s28 }
 0x3d8   : > { %s1488_s28 = smov %s1098_s29  ;;  %s1489_s29 = smov %s1194_s14 }
 0x3d9   : > { %s1490_s30 = smov %s1182_s11  ;;  %23 = sbr.rel (!%p21_p2) target bundleno = 5 (0x5), region = 97 }
 0x3e0   :  { %824 = vsyncpa [#allocation3], 1 }
 0x3e1   :  { %826 = vsyncpa [#allocation3 + $0x1], 1 }
 0x3e2   :  { %827 = vsyncpa [#allocation4], 1 }
 0x3e3   :  { %829 = vsyncpa [#allocation4 + $0x1], 1 }

</bundles_post_ra>
